<compile_context>
chip_gen: v7x
topology: tpu7x:2x2x1
jax: 0.10.0
libtpu: 0.0.40
codegen_flags: <defaults>
</compile_context>

<pallas_src>
import jax
import jax.numpy as jnp
from jax.experimental import pallas as pl
from jax.experimental.pallas import tpu as pltpu

LANES = 128
TILE_BYTES_CAP = 4 * 1024 * 1024   # ~4 MiB per block
VMEM_LIMIT_BYTES = 48 << 20        # raise scoped VMEM; safe on v5e/v6e/v7x


def _relu_kernel(x_ref, o_ref):
    # max(x, 0): single VPU vmax; NaNs pass through like the torch mask op.
    o_ref[...] = jnp.maximum(x_ref[...], 0)


def _sublane_pack(itemsize: int) -> int:
    """Dtype-aware sublane alignment: f32 -> 8, bf16/f16 -> 16, int8/fp8 -> 32."""
    return max(8, 32 // itemsize)


def _pick_lane_width(n: int) -> int:
    """Widest lane-dense last dim that exactly divides n (wide unmasked stores)."""
    for w in (1024, 512, 256, 128):
        if n % w == 0:
            return w
    return LANES  # tail handled with a tiny pad


def _pick_block_rows(rows: int, lane_w: int, itemsize: int) -> int:
    pack = _sublane_pack(itemsize)
    if rows <= pack:
        # Single block equal to the full array dims — always a legal block.
        return rows
    max_rows = max(pack, (TILE_BYTES_CAP // (lane_w * itemsize)) // pack * pack)
    if rows <= max_rows:
        # Split into >= 2 blocks so both v7x TensorCores get work.
        half = pl.cdiv(rows, 2)
        return max(pack, pl.cdiv(half, pack) * pack)
    return max_rows


def relu_pallas(x, donate_input: bool = False):
    """Elementwise ReLU matching the PyTorch module's forward (x[x<0]=0)."""
    orig_shape = x.shape
    orig_dtype = x.dtype
    n = x.size
    if n == 0:
        return x

    itemsize = jnp.dtype(orig_dtype).itemsize
    lane_w = _pick_lane_width(n)

    flat = x.reshape(-1)
    pad = (-n) % lane_w  # at most lane_w - 1 elems; 0 whenever 128 | n
    if pad:
        flat = jnp.pad(flat, (0, pad))
    rows = (n + pad) // lane_w

    block_rows = _pick_block_rows(rows, lane_w, itemsize)
    # Grid overcoverage: Pallas masks the partial last block, no divisor search.
    grid = (pl.cdiv(rows, block_rows),)

    slab = flat.reshape(rows, lane_w)

    out_slab = pl.pallas_call(
        _relu_kernel,
        out_shape=jax.ShapeDtypeStruct((rows, lane_w), orig_dtype),
        grid_spec=pltpu.PrefetchScalarGridSpec(
            num_scalar_prefetch=0,
            grid=grid,
            in_specs=[pl.BlockSpec((block_rows, lane_w), lambda i: (i, 0))],
            out_specs=pl.BlockSpec((block_rows, lane_w), lambda i: (i, 0)),
        ),
        compiler_params=pltpu.CompilerParams(
            dimension_semantics=("parallel",),
            vmem_limit_bytes=VMEM_LIMIT_BYTES,
        ),
        cost_estimate=pl.CostEstimate(
            flops=n, transcendentals=0, bytes_accessed=2 * n * itemsize),
        input_output_aliases={0: 0} if donate_input else {},
    )(slab)

    out_flat = out_slab.reshape(-1)
    if pad:
        out_flat = out_flat[:n]
    return out_flat.reshape(orig_shape)


if __name__ == "__main__":
    key = jax.random.PRNGKey(0)

    # NCHW input, small shape consistent with a generic conv-style feature map.
    x = jax.random.normal(key, (2, 4, 16, 16), dtype=jnp.float32)
    y = relu_pallas(x)
    jax.block_until_ready(y)
    assert y.shape == x.shape and y.dtype == x.dtype
    assert jnp.allclose(y, jnp.maximum(x, 0.0)), "mismatch vs reference ReLU"

    # Small odd-sized input to exercise the sub-128 tail padding path.
    x2 = jax.random.normal(jax.random.PRNGKey(1), (3, 5, 7), dtype=jnp.float32)
    y2 = relu_pallas(x2)
    jax.block_until_ready(y2)
    assert jnp.allclose(y2, jnp.maximum(x2, 0.0)), "mismatch (odd shape)"

    # Moderate f32 input that exercises the >=2 block split (multi-TC path).
    x3 = jax.random.normal(jax.random.PRNGKey(2), (512, 512), dtype=jnp.float32)
    y3 = relu_pallas(x3)
    jax.block_until_ready(y3)
    assert jnp.allclose(y3, jnp.maximum(x3, 0.0)), "mismatch (512x512)"

    # bf16 input to exercise dtype-aware sublane alignment.
    x4 = jax.random.normal(jax.random.PRNGKey(3), (8, 2048), dtype=jnp.bfloat16)
    y4 = relu_pallas(x4)
    jax.block_until_ready(y4)
    assert jnp.array_equal(y4, jnp.maximum(x4, 0)), "mismatch (bf16)"

    print("KERNEL_OK")
</pallas_src>

<mosaic_0001>
module attributes {stable_mosaic.version = 11 : i64} {
  func.func @_relu_kernel(%arg0: i32, %arg1: memref<2x1024xf32, #tpu.memory_space<vmem>>, %arg2: memref<2x1024xf32, #tpu.memory_space<vmem>>) attributes {dimension_semantics = [#tpu.dimension_semantics<parallel>], iteration_bounds = array<i64: 1>, scalar_prefetch = 0 : i64, scratch_operands = 0 : i64, tpu.core_type = #tpu.core_type<tc>, window_params = [{transform_indices = @transform_0, window_bounds = array<i64: 2, 1024>}, {transform_indices = @transform_1, window_bounds = array<i64: 2, 1024>}]} {
    %c0 = arith.constant 0 : index
    %c0_0 = arith.constant 0 : index
    %0 = vector.load %arg1[%c0, %c0_0] : memref<2x1024xf32, #tpu.memory_space<vmem>>, vector<2x1024xf32>
    %cst = arith.constant 0.000000e+00 : f32
    %1 = vector.broadcast %cst : f32 to vector<2x1024xf32>
    %2 = arith.maximumf %0, %1 : vector<2x1024xf32>
    %c0_1 = arith.constant 0 : index
    %c0_2 = arith.constant 0 : index
    %3 = vector.load %arg2[%c0_1, %c0_2] : memref<2x1024xf32, #tpu.memory_space<vmem>>, vector<2x1024xf32>
    tpu.vector_store %arg2[%c0_1, %c0_2], %2 {strides = array<i32>} : memref<2x1024xf32, #tpu.memory_space<vmem>>, vector<2x1024xf32>,
    return
  }
  func.func @transform_0(%arg0: i32) -> (i32, i32) {
    %c0_i32 = arith.constant 0 : i32
    %c0_i32_0 = arith.constant 0 : i32
    return %arg0, %c0_i32 : i32, i32
  }
  func.func @transform_1(%arg0: i32) -> (i32, i32) {
    %c0_i32 = arith.constant 0 : i32
    %c0_i32_0 = arith.constant 0 : i32
    return %arg0, %c0_i32 : i32, i32
  }
}

</mosaic_0001>

<bundles_post_ra>
// kernel: tpu_custom_call.1
= control target key start
LH: loop header
LB: loop body
LE: loop exit
PB: predicated region body
PF: predicated region fallthrough
CT: control target
= control target key end

     0   :  { %6 = vsyncpa [#allocation3], 0  ;;  %s128_s0 = inlined_call_operand.hbm [shape: f32[2,1024], index: 0, kind: input, shape index: {}]   ;;  %s129_s1 = inlined_call_operand.hbm [shape: f32[2,1024], index: 1, kind: output, shape index: {}]  }
   0x1   :  { %7 = vsyncpa [#allocation4], 0  ;;  %s92_s6 = smov [#allocation2]   ;;  %s44_s10 = scalar_lea.hbm %s128_s0, 256 }
   0x2   :  { %s14_s7 = sshll.u32 %s92_s6, 4  ;;  %p45_p0 = scmp.ne.s32.totalorder %s128_s0, %s44_s10  ;;  %s15_s7 = int_to_ptr.vmem [resolvable:$true] %s14_s7 }
   0x3   :  { %p48_p1 = scmp.lt.u32.totalorder %s44_s10, %s128_s0 }
   0x5   :  { %p50_p2 = pnand %p48_p1, %p45_p0 }
   0x7   :  { %53 = shalt.err (!%p50_p2)
}
   0x8   :  { %s54_s15 = scalar_lea.vmem %s15_s7, 256  ;;  %p59_p4 = scmp.lt.s32.totalorder %s15_s7, %s15_s7 }
   0x9   :  { %p55_p3 = scmp.ne.s32.totalorder %s15_s7, %s54_s15  ;;  %p60_p5 = scmp.lt.s32.totalorder %s54_s15, %s54_s15 }
   0xb   :  { %p61_p6 = por %p60_p5, %p59_p4 }
   0xd   :  { %p62_p7 = pnand %p61_p6, %p55_p3 }
   0xf   :  { %65 = shalt.err (!%p62_p7)
}
  0x10   :  { %17 = dma.hbm_to_vmem [thread:$0]  %s128_s0, 256, %s15_s7, [#allocation3]  }
  0x11   :  { %88 = dma.done.wait [#allocation3], 256  }
  0x12   :  { %89 = vsyncadd [#allocation3], 4294967040  ;;  %s93_s18 = smov [#allocation5]   ;;  %v21_v0 = vld [vmem:[#allocation2] sm:$0xff]  ;;  %v22_v1 = vld [vmem:[#allocation2 + $0x8] sm:$0xff] }
  0x13   :  { %s33_s19 = sshll.u32 %s93_s18, 4  ;;  %v23_v2 = vmax.f32 %v21_v0, 0.0  ;;  %v24_v3 = vmax.f32 %v22_v1, 0.0  ;;  %s34_s19 = int_to_ptr.vmem [resolvable:$true] %s33_s19 }
  0x14   :  { %s66_s20 = scalar_lea.vmem %s34_s19, 256  ;;  %p71_p9 = scmp.lt.s32.totalorder %s34_s19, %s34_s19 }
  0x15   :  { %25 = vst [vmem:[#allocation5] sm:$0xff] %v23_v2  ;;  %26 = vst [vmem:[#allocation5 + $0x8] sm:$0xff] %v24_v3  ;;  %p67_p8 = scmp.ne.s32.totalorder %s34_s19, %s66_s20  ;;  %p72_p10 = scmp.lt.s32.totalorder %s66_s20, %s66_s20 }
  0x17   :  { %p73_p11 = por %p72_p10, %p71_p9 }
  0x19   :  { %p74_p12 = pnand %p73_p11, %p67_p8 }
  0x1b   :  { %77 = shalt.err (!%p74_p12)
}
  0x1c   :  { %s78_s22 = scalar_lea.hbm %s129_s1, 256 }
  0x1d   :  { %p79_p13 = scmp.ne.s32.totalorder %s129_s1, %s78_s22  ;;  %p82_p0 = scmp.lt.u32.totalorder %s78_s22, %s129_s1 }
  0x1f   :  { %p84_p1 = pnand %p82_p0, %p79_p13 }
  0x21   :  { %87 = shalt.err (!%p84_p1)
}
  0x22   :  { %36 = dma.vmem_to_hbm [thread:$0]  %s34_s19, 256, %s129_s1, [#allocation4]  }
  0x23   :  { %90 = dma.done.wait [#allocation4], 256  }
  0x24   :  { %91 = vsyncadd [#allocation4], 4294967040 }
  0x25   :  { %40 = vsyncpa [#allocation3], 1 }
  0x26   :  { %41 = vsyncpa [#allocation4], 1 }

</bundles_post_ra>
